<compile_context>
chip_gen: v7x
topology: tpu7x:2x2x1
jax: 0.10.0
libtpu: 0.0.40
codegen_flags: <defaults>
</compile_context>

<pallas_src>
import jax
import jax.numpy as jnp
from jax.experimental import pallas as pl
from jax.experimental.pallas import tpu as pltpu


def rnn_kernel(x_ref, whh_t_ref, wxh_t_ref, b_ref, h_ref):
    """Whole-sequence RNN recurrence for one batch tile.

    x_ref:     (seq, batch_tile, x_dim)   time-major inputs
    whh_t_ref: (h_dim, h_dim)             W_hh.T (pre-transposed)
    wxh_t_ref: (x_dim, h_dim)             W_xh.T (pre-transposed)
    b_ref:     (1, h_dim)                 bias row
    h_ref:     (batch_tile, h_dim)        output: last-step pre-activation H
    """
    seq, bt, x_dim = x_ref.shape
    h_dim = h_ref.shape[-1]

    whh_t = whh_t_ref[...]

    # One MXU pass for every timestep's input projection + bias:
    #   xwb[t] = X[t] @ W_xh.T + b
    x_all = x_ref[...].reshape(seq * bt, x_dim)
    xwb = (
        jnp.dot(x_all, wxh_t_ref[...], preferred_element_type=jnp.float32)
        + b_ref[...]
    ).reshape(seq, bt, h_dim)

    if seq == 1:
        # Loop over X[:-1] is empty; H = 0 @ W_hh.T + X[0] @ W_xh.T + b (no sigmoid).
        h_ref[...] = xwb[0]
    else:
        # t = 0: H starts at zero, so H @ W_hh.T == 0.
        H = jax.nn.sigmoid(xwb[0])
        # t = 1 .. seq-2: sigmoid steps (statically unrolled; seq is small & static).
        for t in range(1, seq - 1):
            H = jax.nn.sigmoid(
                jnp.dot(H, whh_t, preferred_element_type=jnp.float32) + xwb[t]
            )
        # Last step: no sigmoid (strategic=False, extra=False).
        h_ref[...] = (
            jnp.dot(H, whh_t, preferred_element_type=jnp.float32) + xwb[seq - 1]
        )


def my_rnn_forward(X, W_hh, W_xh, W_hy, b, *, batch_tile=None):
    """X: (batch, seq_len, x_dim) float32 -> (batch,) float32."""
    batch, seq_len, x_dim = X.shape
    h_dim = W_hh.shape[0]

    if batch_tile is None:
        batch_tile = batch
    assert batch % batch_tile == 0, "batch must be divisible by batch_tile"
    n_tiles = batch // batch_tile

    Xs = jnp.transpose(X, (1, 0, 2)).astype(jnp.float32)   # (seq, batch, x_dim)
    W_hh_T = jnp.transpose(W_hh).astype(jnp.float32)        # (h_dim, h_dim)
    W_xh_T = jnp.transpose(W_xh).astype(jnp.float32)        # (x_dim, h_dim)
    b2 = b.reshape(1, h_dim).astype(jnp.float32)             # (1, h_dim)

    h_last = pl.pallas_call(
        rnn_kernel,
        out_shape=jax.ShapeDtypeStruct((batch, h_dim), jnp.float32),
        grid_spec=pltpu.PrefetchScalarGridSpec(
            num_scalar_prefetch=0,
            grid=(n_tiles,),
            in_specs=[
                pl.BlockSpec((seq_len, batch_tile, x_dim), lambda i: (0, i, 0)),
                pl.BlockSpec((h_dim, h_dim), lambda i: (0, 0)),
                pl.BlockSpec((x_dim, h_dim), lambda i: (0, 0)),
                pl.BlockSpec((1, h_dim), lambda i: (0, 0)),
            ],
            out_specs=pl.BlockSpec((batch_tile, h_dim), lambda i: (i, 0)),
        ),
        compiler_params=pltpu.CompilerParams(
            # Batch tiles are independent -> shard across cores (v7x megacore).
            dimension_semantics=("parallel",),
        ),
    )(Xs, W_hh_T, W_xh_T, b2)

    # Scalar projection done in XLA: a 1-lane matvec inside the kernel would waste
    # an MXU pass and force masked (batch, 1) stores.
    return jnp.dot(h_last, W_hy.astype(jnp.float32))          # (batch,)


def reference_forward(X, W_hh, W_xh, W_hy, b):
    """Pure-JAX reference mirroring the PyTorch forward."""
    batch, seq_len, _ = X.shape
    h_dim = W_hh.shape[0]
    Xs = jnp.transpose(X, (1, 0, 2))
    H = jnp.zeros((batch, h_dim), jnp.float32)
    for t in range(seq_len - 1):
        H = jax.nn.sigmoid(H @ W_hh.T + Xs[t] @ W_xh.T + b)
    H = H @ W_hh.T + Xs[-1] @ W_xh.T + b
    return H @ W_hy.T


if __name__ == "__main__":
    # Small shapes consistent with the module's forward.
    batch, seq_len, x_dim, h_dim = 8, 8, 16, 32

    key = jax.random.PRNGKey(0)
    kx, k1, k2, k3, k4 = jax.random.split(key, 5)

    # Deterministic parameter init mimicking sqrt(1/dim) * (1 - 2*U[0,1)).
    W_hh = (1.0 / jnp.sqrt(h_dim)) * (1.0 - 2.0 * jax.random.uniform(k1, (h_dim, h_dim), jnp.float32))
    W_xh = (1.0 / jnp.sqrt(x_dim)) * (1.0 - 2.0 * jax.random.uniform(k2, (h_dim, x_dim), jnp.float32))
    W_hy = (1.0 / jnp.sqrt(h_dim)) * (1.0 - 2.0 * jax.random.uniform(k3, (h_dim,), jnp.float32))
    b    = (1.0 / jnp.sqrt(h_dim)) * (1.0 - 2.0 * jax.random.uniform(k4, (h_dim,), jnp.float32))

    X = jax.random.normal(kx, (batch, seq_len, x_dim), jnp.float32)

    y = jax.block_until_ready(my_rnn_forward(X, W_hh, W_xh, W_hy, b))
    y_ref = reference_forward(X, W_hh, W_xh, W_hy, b)

    assert y.shape == (batch,)
    assert jnp.allclose(y, y_ref, atol=1e-5, rtol=1e-5)
    print("KERNEL_OK")
</pallas_src>

<mosaic_0001>
module attributes {stable_mosaic.version = 11 : i64} {
  func.func @rnn_kernel(%arg0: i32, %arg1: memref<8x8x16xf32, #tpu.memory_space<vmem>>, %arg2: memref<32x32xf32, #tpu.memory_space<vmem>>, %arg3: memref<16x32xf32, #tpu.memory_space<vmem>>, %arg4: memref<1x32xf32, #tpu.memory_space<vmem>>, %arg5: memref<8x32xf32, #tpu.memory_space<vmem>>) attributes {dimension_semantics = [#tpu.dimension_semantics<parallel>], iteration_bounds = array<i64: 1>, scalar_prefetch = 0 : i64, scratch_operands = 0 : i64, tpu.core_type = #tpu.core_type<tc>, window_params = [{transform_indices = @transform_0, window_bounds = array<i64: 8, 8, 16>}, {pipeline_mode = #tpu.pipeline_mode<synchronous>, transform_indices = @transform_1, window_bounds = array<i64: 32, 32>}, {pipeline_mode = #tpu.pipeline_mode<synchronous>, transform_indices = @transform_2, window_bounds = array<i64: 16, 32>}, {pipeline_mode = #tpu.pipeline_mode<synchronous>, transform_indices = @transform_3, window_bounds = array<i64: 1, 32>}, {transform_indices = @transform_4, window_bounds = array<i64: 8, 32>}]} {
    %c0 = arith.constant 0 : index
    %c0_0 = arith.constant 0 : index
    %0 = vector.load %arg2[%c0, %c0_0] : memref<32x32xf32, #tpu.memory_space<vmem>>, vector<32x32xf32>
    %c0_1 = arith.constant 0 : index
    %c0_2 = arith.constant 0 : index
    %c0_3 = arith.constant 0 : index
    %1 = vector.load %arg1[%c0_1, %c0_2, %c0_3] : memref<8x8x16xf32, #tpu.memory_space<vmem>>, vector<8x8x16xf32>
    %2 = vector.shape_cast %1 : vector<8x8x16xf32> to vector<64x16xf32>
    %c0_4 = arith.constant 0 : index
    %c0_5 = arith.constant 0 : index
    %3 = vector.load %arg3[%c0_4, %c0_5] : memref<16x32xf32, #tpu.memory_space<vmem>>, vector<16x32xf32>
    %cst = arith.constant dense<0.000000e+00> : vector<64x32xf32>
    %4 = tpu.matmul %2, %3, %cst {dimension_numbers = #tpu.dot_dimension_numbers<[1], [0], [0], [1], [0, 0, 1, 1], [], []>} : vector<64x16xf32>, vector<16x32xf32>, vector<64x32xf32> -> vector<64x32xf32>
    %c0_6 = arith.constant 0 : index
    %c0_7 = arith.constant 0 : index
    %5 = vector.load %arg4[%c0_6, %c0_7] : memref<1x32xf32, #tpu.memory_space<vmem>>, vector<1x32xf32>
    %6 = vector.broadcast %5 : vector<1x32xf32> to vector<64x32xf32>
    %7 = arith.addf %4, %6 : vector<64x32xf32>
    %8 = vector.shape_cast %7 : vector<64x32xf32> to vector<8x8x32xf32>
    %9 = vector.extract_strided_slice %8 {offsets = [0, 0, 0], sizes = [1, 8, 32], strides = [1, 1, 1]} : vector<8x8x32xf32> to vector<1x8x32xf32>
    %10 = vector.shape_cast %9 : vector<1x8x32xf32> to vector<8x32xf32>
    %11 = arith.negf %10 : vector<8x32xf32>
    %12 = math.exp %11 : vector<8x32xf32>
    %cst_8 = arith.constant 1.000000e+00 : f32
    %13 = vector.broadcast %cst_8 : f32 to vector<8x32xf32>
    %14 = arith.addf %13, %12 : vector<8x32xf32>
    %15 = arith.divf %13, %14 : vector<8x32xf32>
    %cst_9 = arith.constant dense<0.000000e+00> : vector<8x32xf32>
    %16 = tpu.matmul %15, %0, %cst_9 {dimension_numbers = #tpu.dot_dimension_numbers<[1], [0], [0], [1], [0, 0, 1, 1], [], []>} : vector<8x32xf32>, vector<32x32xf32>, vector<8x32xf32> -> vector<8x32xf32>
    %17 = vector.extract_strided_slice %8 {offsets = [1, 0, 0], sizes = [1, 8, 32], strides = [1, 1, 1]} : vector<8x8x32xf32> to vector<1x8x32xf32>
    %18 = vector.shape_cast %17 : vector<1x8x32xf32> to vector<8x32xf32>
    %19 = arith.addf %16, %18 : vector<8x32xf32>
    %20 = arith.negf %19 : vector<8x32xf32>
    %21 = math.exp %20 : vector<8x32xf32>
    %cst_10 = arith.constant 1.000000e+00 : f32
    %22 = vector.broadcast %cst_10 : f32 to vector<8x32xf32>
    %23 = arith.addf %22, %21 : vector<8x32xf32>
    %24 = arith.divf %22, %23 : vector<8x32xf32>
    %cst_11 = arith.constant dense<0.000000e+00> : vector<8x32xf32>
    %25 = tpu.matmul %24, %0, %cst_11 {dimension_numbers = #tpu.dot_dimension_numbers<[1], [0], [0], [1], [0, 0, 1, 1], [], []>} : vector<8x32xf32>, vector<32x32xf32>, vector<8x32xf32> -> vector<8x32xf32>
    %26 = vector.extract_strided_slice %8 {offsets = [2, 0, 0], sizes = [1, 8, 32], strides = [1, 1, 1]} : vector<8x8x32xf32> to vector<1x8x32xf32>
    %27 = vector.shape_cast %26 : vector<1x8x32xf32> to vector<8x32xf32>
    %28 = arith.addf %25, %27 : vector<8x32xf32>
    %29 = arith.negf %28 : vector<8x32xf32>
    %30 = math.exp %29 : vector<8x32xf32>
    %cst_12 = arith.constant 1.000000e+00 : f32
    %31 = vector.broadcast %cst_12 : f32 to vector<8x32xf32>
    %32 = arith.addf %31, %30 : vector<8x32xf32>
    %33 = arith.divf %31, %32 : vector<8x32xf32>
    %cst_13 = arith.constant dense<0.000000e+00> : vector<8x32xf32>
    %34 = tpu.matmul %33, %0, %cst_13 {dimension_numbers = #tpu.dot_dimension_numbers<[1], [0], [0], [1], [0, 0, 1, 1], [], []>} : vector<8x32xf32>, vector<32x32xf32>, vector<8x32xf32> -> vector<8x32xf32>
    %35 = vector.extract_strided_slice %8 {offsets = [3, 0, 0], sizes = [1, 8, 32], strides = [1, 1, 1]} : vector<8x8x32xf32> to vector<1x8x32xf32>
    %36 = vector.shape_cast %35 : vector<1x8x32xf32> to vector<8x32xf32>
    %37 = arith.addf %34, %36 : vector<8x32xf32>
    %38 = arith.negf %37 : vector<8x32xf32>
    %39 = math.exp %38 : vector<8x32xf32>
    %cst_14 = arith.constant 1.000000e+00 : f32
    %40 = vector.broadcast %cst_14 : f32 to vector<8x32xf32>
    %41 = arith.addf %40, %39 : vector<8x32xf32>
    %42 = arith.divf %40, %41 : vector<8x32xf32>
    %cst_15 = arith.constant dense<0.000000e+00> : vector<8x32xf32>
    %43 = tpu.matmul %42, %0, %cst_15 {dimension_numbers = #tpu.dot_dimension_numbers<[1], [0], [0], [1], [0, 0, 1, 1], [], []>} : vector<8x32xf32>, vector<32x32xf32>, vector<8x32xf32> -> vector<8x32xf32>
    %44 = vector.extract_strided_slice %8 {offsets = [4, 0, 0], sizes = [1, 8, 32], strides = [1, 1, 1]} : vector<8x8x32xf32> to vector<1x8x32xf32>
    %45 = vector.shape_cast %44 : vector<1x8x32xf32> to vector<8x32xf32>
    %46 = arith.addf %43, %45 : vector<8x32xf32>
    %47 = arith.negf %46 : vector<8x32xf32>
    %48 = math.exp %47 : vector<8x32xf32>
    %cst_16 = arith.constant 1.000000e+00 : f32
    %49 = vector.broadcast %cst_16 : f32 to vector<8x32xf32>
    %50 = arith.addf %49, %48 : vector<8x32xf32>
    %51 = arith.divf %49, %50 : vector<8x32xf32>
    %cst_17 = arith.constant dense<0.000000e+00> : vector<8x32xf32>
    %52 = tpu.matmul %51, %0, %cst_17 {dimension_numbers = #tpu.dot_dimension_numbers<[1], [0], [0], [1], [0, 0, 1, 1], [], []>} : vector<8x32xf32>, vector<32x32xf32>, vector<8x32xf32> -> vector<8x32xf32>
    %53 = vector.extract_strided_slice %8 {offsets = [5, 0, 0], sizes = [1, 8, 32], strides = [1, 1, 1]} : vector<8x8x32xf32> to vector<1x8x32xf32>
    %54 = vector.shape_cast %53 : vector<1x8x32xf32> to vector<8x32xf32>
    %55 = arith.addf %52, %54 : vector<8x32xf32>
    %56 = arith.negf %55 : vector<8x32xf32>
    %57 = math.exp %56 : vector<8x32xf32>
    %cst_18 = arith.constant 1.000000e+00 : f32
    %58 = vector.broadcast %cst_18 : f32 to vector<8x32xf32>
    %59 = arith.addf %58, %57 : vector<8x32xf32>
    %60 = arith.divf %58, %59 : vector<8x32xf32>
    %cst_19 = arith.constant dense<0.000000e+00> : vector<8x32xf32>
    %61 = tpu.matmul %60, %0, %cst_19 {dimension_numbers = #tpu.dot_dimension_numbers<[1], [0], [0], [1], [0, 0, 1, 1], [], []>} : vector<8x32xf32>, vector<32x32xf32>, vector<8x32xf32> -> vector<8x32xf32>
    %62 = vector.extract_strided_slice %8 {offsets = [6, 0, 0], sizes = [1, 8, 32], strides = [1, 1, 1]} : vector<8x8x32xf32> to vector<1x8x32xf32>
    %63 = vector.shape_cast %62 : vector<1x8x32xf32> to vector<8x32xf32>
    %64 = arith.addf %61, %63 : vector<8x32xf32>
    %65 = arith.negf %64 : vector<8x32xf32>
    %66 = math.exp %65 : vector<8x32xf32>
    %cst_20 = arith.constant 1.000000e+00 : f32
    %67 = vector.broadcast %cst_20 : f32 to vector<8x32xf32>
    %68 = arith.addf %67, %66 : vector<8x32xf32>
    %69 = arith.divf %67, %68 : vector<8x32xf32>
    %cst_21 = arith.constant dense<0.000000e+00> : vector<8x32xf32>
    %70 = tpu.matmul %69, %0, %cst_21 {dimension_numbers = #tpu.dot_dimension_numbers<[1], [0], [0], [1], [0, 0, 1, 1], [], []>} : vector<8x32xf32>, vector<32x32xf32>, vector<8x32xf32> -> vector<8x32xf32>
    %71 = vector.extract_strided_slice %8 {offsets = [7, 0, 0], sizes = [1, 8, 32], strides = [1, 1, 1]} : vector<8x8x32xf32> to vector<1x8x32xf32>
    %72 = vector.shape_cast %71 : vector<1x8x32xf32> to vector<8x32xf32>
    %73 = arith.addf %70, %72 : vector<8x32xf32>
    %c0_22 = arith.constant 0 : index
    %c0_23 = arith.constant 0 : index
    %74 = vector.load %arg5[%c0_22, %c0_23] : memref<8x32xf32, #tpu.memory_space<vmem>>, vector<8x32xf32>
    tpu.vector_store %arg5[%c0_22, %c0_23], %73 {strides = array<i32>} : memref<8x32xf32, #tpu.memory_space<vmem>>, vector<8x32xf32>,
    return
  }
  func.func @transform_0(%arg0: i32) -> (i32, i32, i32) {
    %c0_i32 = arith.constant 0 : i32
    %c0_i32_0 = arith.constant 0 : i32
    %c0_i32_1 = arith.constant 0 : i32
    return %c0_i32, %arg0, %c0_i32_0 : i32, i32, i32
  }
  func.func @transform_1(%arg0: i32) -> (i32, i32) {
    %c0_i32 = arith.constant 0 : i32
    %c0_i32_0 = arith.constant 0 : i32
    %c0_i32_1 = arith.constant 0 : i32
    return %c0_i32, %c0_i32_0 : i32, i32
  }
  func.func @transform_2(%arg0: i32) -> (i32, i32) {
    %c0_i32 = arith.constant 0 : i32
    %c0_i32_0 = arith.constant 0 : i32
    %c0_i32_1 = arith.constant 0 : i32
    return %c0_i32, %c0_i32_0 : i32, i32
  }
  func.func @transform_3(%arg0: i32) -> (i32, i32) {
    %c0_i32 = arith.constant 0 : i32
    %c0_i32_0 = arith.constant 0 : i32
    %c0_i32_1 = arith.constant 0 : i32
    return %c0_i32, %c0_i32_0 : i32, i32
  }
  func.func @transform_4(%arg0: i32) -> (i32, i32) {
    %c0_i32 = arith.constant 0 : i32
    %c0_i32_0 = arith.constant 0 : i32
    return %arg0, %c0_i32 : i32, i32
  }
}

</mosaic_0001>

<bundles_post_ra>
// kernel: tpu_custom_call.1
= control target key start
LH: loop header
LB: loop body
LE: loop exit
PB: predicated region body
PF: predicated region fallthrough
CT: control target
= control target key end

     0   :  { %9 = vsyncpa [#allocation3], 0  ;;  %s1292_s0 = inlined_call_operand.hbm [shape: f32[8,8,16], index: 0, kind: input, shape index: {}]   ;;  %s1293_s1 = inlined_call_operand.hbm [shape: f32[32,32], index: 1, kind: input, shape index: {}]   ;;  %s1294_s2 = inlined_call_operand.hbm [shape: f32[16,32], index: 2, kind: input, shape index: {}]   ;;  %s1295_s3 = inlined_call_operand.vmem [shape: f32[1,32], index: 3, kind: input, shape index: {}]   ;;  %s1296_s4 = inlined_call_operand.hbm [shape: f32[8,32], index: 4, kind: output, shape index: {}]  }
   0x1   :  { %10 = vsyncpa [#allocation6], 0 }
   0x2   :  { %11 = vsyncpa [#allocation4], 0  ;;  %s1119_s15 = smov [#allocation5]   ;;  %s1120_s17 = smov [#allocation2]  }
   0x3   :  { %s29_s16 = sshll.u32 %s1119_s15, 4  ;;  %s17_s18 = sshll.u32 %s1120_s17, 4  ;;  %s30_s16 = int_to_ptr.vmem [resolvable:$true] %s29_s16  ;;  %s1153_s18 = int_to_ptr.vmem [resolvable:$true] %s17_s18 }
   0x4   :  { %s1025_s21 = scalar_lea.hbm %s1293_s1, 512 }
   0x5   :  { %p1026_p0 = scmp.ne.s32.totalorder %s1293_s1, %s1025_s21  ;;  %p1029_p1 = scmp.lt.u32.totalorder %s1025_s21, %s1293_s1 }
   0x7   :  { %p1031_p2 = pnand %p1029_p1, %p1026_p0 }
   0x9   :  { %1034 = shalt.err (!%p1031_p2)
}
   0xa   :  { %s1035_s26 = scalar_lea.vmem %s30_s16, 512  ;;  %p1040_p4 = scmp.lt.s32.totalorder %s30_s16, %s30_s16 }
   0xb   :  { %p1036_p3 = scmp.ne.s32.totalorder %s30_s16, %s1035_s26  ;;  %p1041_p5 = scmp.lt.s32.totalorder %s1035_s26, %s1035_s26 }
   0xd   :  { %p1042_p6 = por %p1041_p5, %p1040_p4 }
   0xf   :  { %p1043_p7 = pnand %p1042_p6, %p1036_p3 }
  0x11   :  { %1046 = shalt.err (!%p1043_p7)
}
  0x12   :  { %s1121_s27 = smov 128   ;;  %s1122_s28 = smov 8  }
  0x13   :  { %35 = dma.hbm_to_vmem [thread:$0]  %s1293_s1, 512, %s30_s16, [#allocation6], %s1121_s27, %s1121_s27, %s1122_s28  }
  0x14   :  { %s1047_s7 = scalar_lea.hbm %s1292_s0, 1024 }
  0x15   :  { %p1048_p8 = scmp.ne.s32.totalorder %s1292_s0, %s1047_s7  ;;  %p1051_p9 = scmp.lt.u32.totalorder %s1047_s7, %s1292_s0 }
  0x17   :  { %p1053_p10 = pnand %p1051_p9, %p1048_p8 }
  0x19   :  { %1056 = shalt.err (!%p1053_p10)
}
  0x1a   :  { %s1057_s12 = scalar_lea.vmem %s1153_s18, 1024  ;;  %p1062_p12 = scmp.lt.s32.totalorder %s1153_s18, %s1153_s18 }
  0x1b   :  { %p1058_p11 = scmp.ne.s32.totalorder %s1153_s18, %s1057_s12  ;;  %p1063_p13 = scmp.lt.s32.totalorder %s1057_s12, %s1057_s12 }
  0x1d   :  { %p1064_p0 = por %p1063_p13, %p1062_p12 }
  0x1f   :  { %p1065_p1 = pnand %p1064_p0, %p1058_p11 }
  0x21   :  { %1068 = shalt.err (!%p1065_p1)
}
  0x22   :  { %23 = dma.hbm_to_vmem [thread:$0]  %s1292_s0, 1024, %s1153_s18, [#allocation3], %s1121_s27, %s1121_s27, %s1122_s28  }
  0x23   :  { %s1123_s14 = smov [#allocation7]   ;;  %s1069_s19 = scalar_lea.hbm %s1294_s2, 256 }
  0x24   :  { %s41_s15 = sshll.u32 %s1123_s14, 4  ;;  %p1070_p2 = scmp.ne.s32.totalorder %s1294_s2, %s1069_s19  ;;  %s42_s15 = int_to_ptr.vmem [resolvable:$true] %s41_s15 }
  0x25   :  { %p1073_p3 = scmp.lt.u32.totalorder %s1069_s19, %s1294_s2 }
  0x27   :  { %p1075_p4 = pnand %p1073_p3, %p1070_p2 }
  0x29   :  { %1078 = shalt.err (!%p1075_p4)
}
  0x2a   :  { %s1079_s24 = scalar_lea.vmem %s42_s15, 256  ;;  %p1084_p6 = scmp.lt.s32.totalorder %s42_s15, %s42_s15 }
  0x2b   :  { %p1080_p5 = scmp.ne.s32.totalorder %s42_s15, %s1079_s24  ;;  %p1085_p7 = scmp.lt.s32.totalorder %s1079_s24, %s1079_s24 }
  0x2d   :  { %p1086_p8 = por %p1085_p7, %p1084_p6 }
  0x2f   :  { %p1087_p9 = pnand %p1086_p8, %p1080_p5 }
  0x31   :  { %1090 = shalt.err (!%p1087_p9)
}
  0x32   :  { %47 = dma.hbm_to_vmem [thread:$0]  %s1294_s2, 256, %s42_s15, [#allocation6], %s1121_s27, %s1121_s27, %s1122_s28  }
  0x33   :  { %1113 = dma.done.wait [#allocation3], 1024  }
  0x34   :  { %1114 = vsyncadd [#allocation3], 4294966272 }
  0x35   :  { %1115 = dma.done.wait [#allocation6], 768  }
  0x36   :  { %1116 = vsyncadd [#allocation6], 4294966528  ;;  %vm80_vm0 = vcmask 130048   ;;  %v71_v0 = vld [vmem:[#allocation7] sm:$0xff]  ;;  %v72_v1 = vld [vmem:[#allocation7 + $0x8] sm:$0xff]  ;;  %v1124_v8 = vmov 0.0|0.0  }
  0x37   :  { %v63_v2 = vld [vmem:[#allocation2] sm:$0xff]  ;;  %v942_v3 = vpack.c.bf16 %v72_v1, %v71_v0  ;;  %v64_v4 = vld [vmem:[#allocation2 + $0x8] sm:$0xff]  ;;  %v61_v7 = vld [vmem:[#allocation5 + $0x10] sm:$0xff]  ;;  %946 = vmatprep.subr.bf16.mxu1 %v1124_v8  ;;  %vm1125_vm1 = vmmov 0   ;;  %v1126_v11 = vmov 0.0   ;;  %vm216_vm2 = vcmask 261120  }
  0x38   :  { %853 = vmatprep.mubr.msk.f32.mxu0 %vm80_vm0, %v63_v2  ;;  %v59_v5 = vld [vmem:[#allocation5] sm:$0xff]  ;;  %v60_v6 = vld [vmem:[#allocation5 + $0x8] sm:$0xff]  ;;  %v62_v10 = vld [vmem:[#allocation5 + $0x18] sm:$0xff]  ;;  %873 = vmatprep.mubr.msk.f32.mxu1 %vm1125_vm1, %v1126_v11 }
  0x39   :  { %943 = vmatprep.subr.bf16.mxu0 %v942_v3  ;;  %v1208_v9 = vpack.c.bf16 %v60_v6, %v59_v5  ;;  %v1214_v12 = vpack.c.bf16 %v62_v10, %v61_v7  ;;  %v1226_v13 = vld [vmem:[%s1295_s3] ss:$0 sm:$0xff]  ;;  %v65_v21 = vld [vmem:[#allocation2 + $0x10] sm:$0xff]  ;;  %v66_v22 = vld [vmem:[#allocation2 + $0x18] sm:$0xff]  ;;  %s1127_s3 = smov [#allocation8]  }
  0x3a   :  { %945 = vmatpush3.bf16.msra.mxu0 %v942_v3  ;;  %v67_v33 = vld [vmem:[#allocation2 + $0x20] sm:$0xff]  ;;  %v68_v34 = vld [vmem:[#allocation2 + $0x28] sm:$0xff]  ;;  %v69_v35 = vld [vmem:[#allocation2 + $0x30] sm:$0xff]  ;;  %s771_s26 = sshll.u32 %s1127_s3, 4  ;;  %s772_s26 = int_to_ptr.vmem [resolvable:$true] %s771_s26 }
  0x3b   :  { %958 = vmatprep.subr.bf16.mxu0 %v1124_v8  ;;  %948 = vmatpush3.bf16.msra.mxu1 %v1208_v9  ;;  %v70_v36 = vld [vmem:[#allocation2 + $0x38] sm:$0xff]  ;;  %s1091_s27 = scalar_lea.vmem %s772_s26, 128  ;;  %p1096_p11 = scmp.lt.s32.totalorder %s772_s26, %s772_s26 }
  0x3c   :  { %949 = vmatprep.subr.bf16.mxu1 %v1124_v8  ;;  %p1092_p10 = scmp.ne.s32.totalorder %s772_s26, %s1091_s27  ;;  %p1097_p12 = scmp.lt.s32.totalorder %s1091_s27, %s1091_s27 }
  0x3d   :  { %854 = vmatmul.mubr.msk.f32.vlgmr.msra.gmra.mrb[0].mxu0 %vm80_vm0, %v64_v4 }
  0x3e   :  { %960 = vmatpush3.bf16.msra.mxu0 %v1208_v9  ;;  %856 = vmatprep.mubr.msk.f32.mxu0 %vm80_vm0, %v65_v21  ;;  %p1098_p13 = por %p1097_p12, %p1096_p11 }
  0x3f   :  { %961 = vmatprep.subr.bf16.mxu0 %v1124_v8  ;;  %951 = vmatpush3.bf16.msra.mxu1 %v1214_v12 }
  0x40   :  { %952 = vmatprep.subr.bf16.mxu1 %v1124_v8  ;;  %p1099_p0 = pnand %p1098_p13, %p1092_p10 }
  0x41   :  { %857 = vmatmul.mubr.msk.f32.gmra.mrb[2].mxu0 %vm80_vm0, %v66_v22 }
  0x42   :  { %963 = vmatpush3.bf16.msra.mxu0 %v1214_v12  ;;  %859 = vmatprep.mubr.msk.f32.mxu0 %vm80_vm0, %v67_v33 }
  0x43   :  { %970 = vmatprep.subr.bf16.mxu0 %v1124_v8 }
  0x45   :  { %860 = vmatmul.mubr.msk.f32.gmra.mrb[4].mxu0 %vm80_vm0, %v68_v34 }
  0x46   :  { %862 = vmatprep.mubr.msk.f32.mxu0 %vm80_vm0, %v69_v35 }
  0x49   :  { %863 = vmatmul.mubr.msk.f32.gmra.mrb[6].mxu0 %vm80_vm0, %v70_v36 }
  0x4a   :  { %895 = vmatprep.mubr.msk.f32.mxu0 %vm1125_vm1, %v1126_v11 }
 0x110   :  { %v855_v14 = vpop.f32.mrb[0].mxu0 }
 0x111   :  { %v171_v15 = vpop.f32.mrb[1].mxu0  ;;  %v177_v23 = vadd.f32 %v855_v14, %v1226_v13 }
 0x112   :  { %v172_v16 = vadd.f32 %v1226_v13, %v171_v15 }
 0x114   :  { %v790_v17 = vmul.f32 -1.442695, %v172_v16  ;;  %v858_v31 = vpop.f32.mrb[2].mxu0 }
 0x115   :  { %v181_v32 = vpop.f32.mrb[3].mxu0  ;;  %v187_v49 = vadd.f32 %v858_v31, %v1226_v13 }
 0x116   :  { %997 = vpow2.f32 %v790_v17  ;;  %v182_v37 = vadd.f32 %v1226_v13, %v181_v32 }
 0x118   :  { %v861_v45 = vpop.f32.mrb[4].mxu0 }
 0x119   :  { %v191_v46 = vpop.f32.mrb[5].mxu0  ;;  %v197_v1 = vadd.f32 %v861_v45, %v1226_v13 }
 0x11a   :  { %v192_v57 = vadd.f32 %v1226_v13, %v191_v46 }
 0x11c   :  { %v864_v47 = vpop.f32.mrb[6].mxu0 }
 0x11d   :  { %v201_v48 = vpop.f32.mrb[7].mxu0 }
 0x120   :  { %v998_v18 = vpop.eup %997 }
 0x121   :  { %v213_v19 = vadd.f32 1.0, %v998_v18  ;;  %v207_v18 = vadd.f32 %v864_v47, %v1226_v13 }
 0x123   :  { %999 = vrcp.f32 %v213_v19 }
 0x12d   :  { %v1000_v20 = vpop.eup %999 }
 0x12e   :  { %874 = vmatmul.mubr.msk.f32.vlgmr.msra.gmra.mrb[0].mxu1 %vm216_vm2, %v1000_v20 }
 0x12f   :  { %954 = vmatpush3.bf16.msra.mxu1 %v1208_v9  ;;  %884 = vmatprep.mubr.msk.f32.mxu1 %vm1125_vm1, %v1126_v11 }
 0x130   :  { %955 = vmatprep.subr.bf16.mxu1 %v1124_v8 }
 0x133   :  { %957 = vmatpush3.bf16.msra.mxu1 %v1214_v12 }
 0x134   :  { %964 = vmatprep.subr.bf16.mxu1 %v1124_v8 }
 0x201   :  { %v286_v24 = vpop.f32.mrb[0].mxu1 }
 0x202   :  { %v287_v25 = vadd.f32 %v286_v24, %v177_v23  ;;  %v875_v26 = vpop.f32.mrb[1].mxu1 }
 0x204   :  { %v792_v27 = vmul.f32 -1.442695, %v287_v25 }
 0x206   :  { %1001 = vpow2.f32 %v792_v27 }
 0x210   :  { %v1002_v28 = vpop.eup %1001 }
 0x211   :  { %v293_v29 = vadd.f32 1.0, %v1002_v28 }
 0x213   :  { %1003 = vrcp.f32 %v293_v29 }
 0x21d   :  { %v1004_v30 = vpop.eup %1003 }
 0x21e   :  { %885 = vmatmul.mubr.msk.f32.vlgmr.msra.gmra.mrb[2].mxu1 %vm216_vm2, %v1004_v30 }
 0x21f   :  { %966 = vmatpush3.bf16.msra.mxu1 %v1208_v9  ;;  %906 = vmatprep.mubr.msk.f32.mxu1 %vm1125_vm1, %v1126_v11 }
 0x220   :  { %967 = vmatprep.subr.bf16.mxu1 %v1124_v8 }
 0x223   :  { %969 = vmatpush3.bf16.msra.mxu1 %v1214_v12 }
 0x224   :  { %976 = vmatprep.subr.bf16.mxu1 %v1124_v8 }
 0x2f1   :  { %v365_v38 = vpop.f32.mrb[2].mxu1 }
 0x2f2   :  { %v366_v39 = vadd.f32 %v365_v38, %v182_v37  ;;  %v886_v40 = vpop.f32.mrb[3].mxu1 }
 0x2f4   :  { %v794_v41 = vmul.f32 -1.442695, %v366_v39 }
 0x2f6   :  { %1005 = vpow2.f32 %v794_v41 }
 0x300   :  { %v1006_v42 = vpop.eup %1005 }
 0x301   :  { %v372_v43 = vadd.f32 1.0, %v1006_v42 }
 0x303   :  { %1007 = vrcp.f32 %v372_v43 }
 0x30d   :  { %v1008_v44 = vpop.eup %1007 }
 0x30e   :  { %896 = vmatmul.mubr.msk.f32.vlgmr.msra.gmra.mrb[8].mxu0 %vm216_vm2, %v1008_v44 }
 0x30f   :  { %972 = vmatpush3.bf16.msra.mxu0 %v1208_v9  ;;  %917 = vmatprep.mubr.msk.f32.mxu0 %vm1125_vm1, %v1126_v11 }
 0x310   :  { %973 = vmatprep.subr.bf16.mxu0 %v1124_v8 }
 0x313   :  { %975 = vmatpush3.bf16.msra.mxu0 %v1214_v12 }
 0x314   :  { %982 = vmatprep.subr.bf16.mxu0 %v1124_v8 }
 0x3e1   :  { %v444_v50 = vpop.f32.mrb[8].mxu0 }
 0x3e2   :  { %v445_v51 = vadd.f32 %v444_v50, %v187_v49  ;;  %v897_v52 = vpop.f32.mrb[9].mxu0 }
 0x3e4   :  { %v796_v53 = vmul.f32 -1.442695, %v445_v51 }
 0x3e6   :  { %1009 = vpow2.f32 %v796_v53 }
 0x3f0   :  { %v1010_v54 = vpop.eup %1009 }
 0x3f1   :  { %v451_v55 = vadd.f32 1.0, %v1010_v54 }
 0x3f3   :  { %1011 = vrcp.f32 %v451_v55 }
 0x3fd   :  { %v1012_v56 = vpop.eup %1011 }
 0x3fe   :  { %907 = vmatmul.mubr.msk.f32.vlgmr.msra.gmra.mrb[4].mxu1 %vm216_vm2, %v1012_v56 }
 0x3ff   :  { %978 = vmatpush3.bf16.msra.mxu1 %v1208_v9  ;;  %928 = vmatprep.mubr.msk.f32.mxu1 %vm1125_vm1, %v1126_v11 }
 0x400   :  { %979 = vmatprep.subr.bf16.mxu1 %v1124_v8 }
 0x403   :  { %981 = vmatpush3.bf16.msra.mxu1 %v1214_v12 }
 0x4d1   :  { %v523_v58 = vpop.f32.mrb[4].mxu1 }
 0x4d2   :  { %v524_v59 = vadd.f32 %v523_v58, %v192_v57  ;;  %v908_v60 = vpop.f32.mrb[5].mxu1 }
 0x4d4   :  { %v798_v61 = vmul.f32 -1.442695, %v524_v59 }
 0x4d6   :  { %1013 = vpow2.f32 %v798_v61 }
 0x4e0   :  { %v1014_v62 = vpop.eup %1013 }
 0x4e1   :  { %v530_v63 = vadd.f32 1.0, %v1014_v62 }
 0x4e3   :  { %1015 = vrcp.f32 %v530_v63 }
 0x4ed   :  { %v1016_v0 = vpop.eup %1015 }
 0x4ee   :  { %918 = vmatmul.mubr.msk.f32.vlgmr.msra.gmra.mrb[10].mxu0 %vm216_vm2, %v1016_v0 }
 0x4ef   :  { %984 = vmatpush3.bf16.msra.mxu0 %v1208_v9  ;;  %939 = vmatprep.mubr.msk.f32.mxu0 %vm1125_vm1, %v1126_v11  ;;  %v202_v9 = vadd.f32 %v1226_v13, %v201_v48 }
 0x4f0   :  { %985 = vmatprep.subr.bf16.mxu0 %v1124_v8 }
 0x4f3   :  { %987 = vmatpush3.bf16.msra.mxu0 %v1214_v12 }
 0x5c1   :  { %v602_v2 = vpop.f32.mrb[10].mxu0 }
 0x5c2   :  { %v603_v3 = vadd.f32 %v602_v2, %v197_v1  ;;  %v919_v4 = vpop.f32.mrb[11].mxu0 }
 0x5c4   :  { %v800_v5 = vmul.f32 -1.442695, %v603_v3 }
 0x5c6   :  { %1017 = vpow2.f32 %v800_v5 }
 0x5d0   :  { %v1018_v6 = vpop.eup %1017 }
 0x5d1   :  { %v609_v7 = vadd.f32 1.0, %v1018_v6 }
 0x5d3   :  { %1019 = vrcp.f32 %v609_v7 }
 0x5dd   :  { %v1020_v10 = vpop.eup %1019 }
 0x5de   :  { %929 = vmatmul.mubr.msk.f32.vlgmr.msra.gmra.mrb[6].mxu1 %vm216_vm2, %v1020_v10 }
 0x6b1   :  { %v681_v11 = vpop.f32.mrb[6].mxu1 }
 0x6b2   :  { %v682_v14 = vadd.f32 %v681_v11, %v202_v9  ;;  %v930_v8 = vpop.f32.mrb[7].mxu1 }
 0x6b4   :  { %v802_v15 = vmul.f32 -1.442695, %v682_v14 }
 0x6b6   :  { %1021 = vpow2.f32 %v802_v15 }
 0x6c0   :  { %v1022_v12 = vpop.eup %1021 }
 0x6c1   :  { %v688_v16 = vadd.f32 1.0, %v1022_v12 }
 0x6c3   :  { %1023 = vrcp.f32 %v688_v16 }
 0x6cd   :  { %v1024_v17 = vpop.eup %1023 }
 0x6ce   :  { %940 = vmatmul.mubr.msk.f32.vlgmr.msra.gmra.mrb[12].mxu0 %vm216_vm2, %v1024_v17 }
 0x7a1   :  { %v760_v19 = vpop.f32.mrb[12].mxu0 }
 0x7a2   :  { %v761_v20 = vadd.f32 %v760_v19, %v207_v18  ;;  %v941_v21 = vpop.f32.mrb[13].mxu0 }
 0x7a4   :  { %764 = vst.msk [vmem:[#allocation8] sm:$0xff] %vm216_vm2, %v761_v20 }
 0x7a5   :  { %1102 = shalt.err (!%p1099_p0)
}
 0x7a6   :  { %s1103_s30 = scalar_lea.hbm %s1296_s4, 128 }
 0x7a7   :  { %p1104_p1 = scmp.ne.s32.totalorder %s1296_s4, %s1103_s30  ;;  %p1107_p2 = scmp.lt.u32.totalorder %s1103_s30, %s1296_s4 }
 0x7a9   :  { %p1109_p3 = pnand %p1107_p2, %p1104_p1 }
 0x7ab   :  { %1112 = shalt.err (!%p1109_p3)
}
 0x7ac   :  { %774 = dma.vmem_to_hbm [thread:$0]  %s772_s26, 128, %s1296_s4, [#allocation4]  }
 0x7ad   :  { %1117 = dma.done.wait [#allocation4], 128  }
 0x7ae   :  { %1118 = vsyncadd [#allocation4], 4294967168 }
 0x7af   :  { %778 = vsyncpa [#allocation3], 1 }
 0x7b0   :  { %779 = vsyncpa [#allocation6], 1 }
 0x7b1   :  { %780 = vsyncpa [#allocation4], 1 }

</bundles_post_ra>
